<compile_context>
chip_gen: v7x
topology: tpu7x:2x2x1
jax: 0.10.0
libtpu: 0.0.40
codegen_flags: <defaults>
</compile_context>

<pallas_src>
import jax
import jax.numpy as jnp
from jax.experimental import pallas as pl
from jax.experimental.pallas import tpu as pltpu

IN_F, HID_F, OUT_F = 10, 100, 10
IN_PAD, HID_PAD, OUT_PAD = 16, 128, 16   # padded feature widths
ROW_ALIGN = 16                           # bf16 sublane packing: row tiles % 16 == 0


def _round_up(n, m):
    return ((n + m - 1) // m) * m


def _sigmoid(z):
    # Single EUP transcendental (tanh); exact formulation of sigmoid.
    return 0.5 * jnp.tanh(0.5 * z) + 0.5


def mlp_kernel(x_ref, w1_ref, b1_ref, w2_ref, b2_ref, w3_ref, b3_ref, o_ref):
    x = x_ref[...]

    # Layer 1: (tm,16) @ (16,128), f32 accumulation, f32 epilogue.
    h1 = jnp.dot(x, w1_ref[...], preferred_element_type=jnp.float32)
    h1 = _sigmoid(h1 + b1_ref[...])
    h1 = h1.astype(w2_ref.dtype)          # bf16 MXU operands on the bf16 path

    # Layer 2: (tm,128) @ (128,128).
    h2 = jnp.dot(h1, w2_ref[...], preferred_element_type=jnp.float32)
    h2 = _sigmoid(h2 + b2_ref[...])
    h2 = h2.astype(w3_ref.dtype)

    # Layer 3: (tm,128) @ (128,16); no activation (matches forward()).
    out = jnp.dot(h2, w3_ref[...], preferred_element_type=jnp.float32)
    o_ref[...] = (out + b3_ref[...]).astype(o_ref.dtype)


def _choose_tiling(batch, tm_max):
    """Pick (padded_batch, row_tile, n_tiles)."""
    bp = _round_up(max(batch, ROW_ALIGN), ROW_ALIGN)
    n_tiles = pl.cdiv(bp, tm_max)
    if bp > 1024:
        # v7x megacore: keep the ("parallel",) batch axis splittable across
        # both TensorCores -> at least 2 tiles, even count for balance.
        n_tiles = _round_up(max(n_tiles, 2), 2)
    tm = _round_up(pl.cdiv(bp, n_tiles), ROW_ALIGN)
    return tm * n_tiles, tm, n_tiles


def mlp_forward(x, padded_params, *, tm=1024, use_bf16=True):
    """x: (B, 10) f32. padded_params: feature-padded f32 weights/biases."""
    w1, b1, w2, b2, w3, b3 = padded_params
    B = x.shape[0]

    in_dtype = jnp.bfloat16 if use_bf16 else jnp.float32
    if use_bf16:
        # bf16 operands for the MXU; biases stay f32 (bias add + sigmoid in f32).
        w1, w2, w3 = (w.astype(jnp.bfloat16) for w in (w1, w2, w3))

    Bp, tm_eff, n_tiles = _choose_tiling(B, tm)

    # Narrow (16-lane) padded input: only real features + minimal pad travel
    # over HBM. Padded lanes/rows are zero and hit zero weight rows, so they
    # never leak into real outputs (hidden pad lanes become sigmoid(0)=0.5 but
    # multiply zero rows of W2/W3).
    x_pad = jnp.zeros((Bp, IN_PAD), in_dtype).at[:B, :IN_F].set(x.astype(in_dtype))

    row_in_spec = pl.BlockSpec((tm_eff, IN_PAD), lambda i: (i, 0))
    row_out_spec = pl.BlockSpec((tm_eff, OUT_PAD), lambda i: (i, 0))

    def const(shape):                      # VMEM-resident params
        return pl.BlockSpec(shape, lambda i: (0, 0))

    out_pad = pl.pallas_call(
        mlp_kernel,
        out_shape=jax.ShapeDtypeStruct((Bp, OUT_PAD), jnp.float32),
        grid=(n_tiles,),
        in_specs=[row_in_spec,
                  const((IN_PAD, HID_PAD)), const((1, HID_PAD)),
                  const((HID_PAD, HID_PAD)), const((1, HID_PAD)),
                  const((HID_PAD, OUT_PAD)), const((1, OUT_PAD))],
        out_specs=row_out_spec,
        compiler_params=pltpu.CompilerParams(
            dimension_semantics=("parallel",)),
    )(x_pad, w1, b1, w2, b2, w3, b3)

    # NOTE: for latency-critical tiny batches, return the padded slab and slice
    # at the consumer to save one extra XLA copy after the kernel.
    return out_pad[:B, :OUT_F]


def init_params(key):
    # PyTorch nn.Linear shapes: W1 (100,10), W2 (100,100), W3 (10,100), b (out,).
    # Stored transposed ([in, out]) so the kernel computes x @ W + b.
    k1, k2, k3, k4, k5, k6 = jax.random.split(key, 6)
    w1t = jax.random.normal(k1, (IN_F, HID_F), jnp.float32) * 0.1
    b1 = jax.random.normal(k2, (HID_F,), jnp.float32) * 0.1
    w2t = jax.random.normal(k3, (HID_F, HID_F), jnp.float32) * 0.1
    b2 = jax.random.normal(k4, (HID_F,), jnp.float32) * 0.1
    w3t = jax.random.normal(k5, (HID_F, OUT_F), jnp.float32) * 0.1
    b3 = jax.random.normal(k6, (OUT_F,), jnp.float32) * 0.1
    return (w1t, b1, w2t, b2, w3t, b3)


def pad_params(params):
    """Zero-pad weights/biases to the kernel's padded feature widths (once)."""
    w1t, b1, w2t, b2, w3t, b3 = params

    def pad2(a, shape):
        out = jnp.zeros(shape, jnp.float32)
        return out.at[: a.shape[0], : a.shape[1]].set(a)

    return (pad2(w1t, (IN_PAD, HID_PAD)),
            pad2(b1[None, :], (1, HID_PAD)),
            pad2(w2t, (HID_PAD, HID_PAD)),
            pad2(b2[None, :], (1, HID_PAD)),
            pad2(w3t, (HID_PAD, OUT_PAD)),
            pad2(b3[None, :], (1, OUT_PAD)))


def mlp_reference(x, params):
    w1t, b1, w2t, b2, w3t, b3 = params
    h1 = jax.nn.sigmoid(x @ w1t + b1)
    h2 = jax.nn.sigmoid(h1 @ w2t + b2)
    return h2 @ w3t + b3


if __name__ == "__main__":
    key = jax.random.PRNGKey(0)
    kx, kp = jax.random.split(key)
    batch = 8
    x = jax.random.normal(kx, (batch, IN_F), jnp.float32)

    params = init_params(kp)
    padded_params = pad_params(params)
    ref = mlp_reference(x, params)

    # f32 operand path: the sigmoid is now exact (tanh form); the residual gap
    # vs. the XLA reference is dominated by TPU default matmul precision
    # (bf16 operand truncation on the MXU), not the kernel, so keep 2e-3.
    out_f32 = jax.block_until_ready(mlp_forward(x, padded_params, use_bf16=False))
    assert out_f32.shape == (batch, OUT_F)
    assert jnp.allclose(out_f32, ref, atol=2e-3, rtol=2e-3), \
        f"f32 path max abs err {jnp.max(jnp.abs(out_f32 - ref))}"

    # Default (bf16 operand) path: halves the batch-scaled HBM read stream and
    # hits the native bf16 MXU; bf16 operand rounding -> looser tolerance.
    out_bf16 = jax.block_until_ready(mlp_forward(x, padded_params))
    assert out_bf16.shape == (batch, OUT_F)
    assert jnp.allclose(out_bf16, ref, atol=2e-2, rtol=2e-2), \
        f"bf16 path max abs err {jnp.max(jnp.abs(out_bf16 - ref))}"

    # TODO(synk): original forward() returns undefined name `Out` (NameError);
    # we implement the clearly-intended `out`.
    print("KERNEL_OK")
</pallas_src>

<mosaic_0001>
module attributes {stable_mosaic.version = 11 : i64} {
  func.func @mlp_kernel(%arg0: i32, %arg1: memref<16x16xf32, #tpu.memory_space<vmem>>, %arg2: memref<16x128xf32, #tpu.memory_space<vmem>>, %arg3: memref<1x128xf32, #tpu.memory_space<vmem>>, %arg4: memref<128x128xf32, #tpu.memory_space<vmem>>, %arg5: memref<1x128xf32, #tpu.memory_space<vmem>>, %arg6: memref<128x16xf32, #tpu.memory_space<vmem>>, %arg7: memref<1x16xf32, #tpu.memory_space<vmem>>, %arg8: memref<16x16xf32, #tpu.memory_space<vmem>>) attributes {dimension_semantics = [#tpu.dimension_semantics<parallel>], iteration_bounds = array<i64: 1>, scalar_prefetch = 0 : i64, scratch_operands = 0 : i64, tpu.core_type = #tpu.core_type<tc>, window_params = [{transform_indices = @transform_0, window_bounds = array<i64: 16, 16>}, {pipeline_mode = #tpu.pipeline_mode<synchronous>, transform_indices = @transform_1, window_bounds = array<i64: 16, 128>}, {pipeline_mode = #tpu.pipeline_mode<synchronous>, transform_indices = @transform_2, window_bounds = array<i64: 1, 128>}, {pipeline_mode = #tpu.pipeline_mode<synchronous>, transform_indices = @transform_3, window_bounds = array<i64: 128, 128>}, {pipeline_mode = #tpu.pipeline_mode<synchronous>, transform_indices = @transform_4, window_bounds = array<i64: 1, 128>}, {pipeline_mode = #tpu.pipeline_mode<synchronous>, transform_indices = @transform_5, window_bounds = array<i64: 128, 16>}, {pipeline_mode = #tpu.pipeline_mode<synchronous>, transform_indices = @transform_6, window_bounds = array<i64: 1, 16>}, {transform_indices = @transform_7, window_bounds = array<i64: 16, 16>}]} {
    %c0 = arith.constant 0 : index
    %c0_0 = arith.constant 0 : index
    %0 = vector.load %arg1[%c0, %c0_0] : memref<16x16xf32, #tpu.memory_space<vmem>>, vector<16x16xf32>
    %c0_1 = arith.constant 0 : index
    %c0_2 = arith.constant 0 : index
    %1 = vector.load %arg2[%c0_1, %c0_2] : memref<16x128xf32, #tpu.memory_space<vmem>>, vector<16x128xf32>
    %cst = arith.constant dense<0.000000e+00> : vector<16x128xf32>
    %2 = tpu.matmul %0, %1, %cst {dimension_numbers = #tpu.dot_dimension_numbers<[1], [0], [0], [1], [0, 0, 1, 1], [], []>} : vector<16x16xf32>, vector<16x128xf32>, vector<16x128xf32> -> vector<16x128xf32>
    %c0_3 = arith.constant 0 : index
    %c0_4 = arith.constant 0 : index
    %3 = vector.load %arg3[%c0_3, %c0_4] : memref<1x128xf32, #tpu.memory_space<vmem>>, vector<1x128xf32>
    %4 = vector.broadcast %3 : vector<1x128xf32> to vector<16x128xf32>
    %5 = arith.addf %2, %4 : vector<16x128xf32>
    %cst_5 = arith.constant 5.000000e-01 : f32
    %6 = vector.broadcast %cst_5 : f32 to vector<16x128xf32>
    %7 = arith.mulf %6, %5 : vector<16x128xf32>
    %8 = math.tanh %7 : vector<16x128xf32>
    %cst_6 = arith.constant 5.000000e-01 : f32
    %9 = vector.broadcast %cst_6 : f32 to vector<16x128xf32>
    %10 = arith.mulf %9, %8 : vector<16x128xf32>
    %cst_7 = arith.constant 5.000000e-01 : f32
    %11 = vector.broadcast %cst_7 : f32 to vector<16x128xf32>
    %12 = arith.addf %10, %11 : vector<16x128xf32>
    %c0_8 = arith.constant 0 : index
    %c0_9 = arith.constant 0 : index
    %13 = vector.load %arg4[%c0_8, %c0_9] : memref<128x128xf32, #tpu.memory_space<vmem>>, vector<128x128xf32>
    %cst_10 = arith.constant dense<0.000000e+00> : vector<16x128xf32>
    %14 = tpu.matmul %12, %13, %cst_10 {dimension_numbers = #tpu.dot_dimension_numbers<[1], [0], [0], [1], [0, 0, 1, 1], [], []>} : vector<16x128xf32>, vector<128x128xf32>, vector<16x128xf32> -> vector<16x128xf32>
    %c0_11 = arith.constant 0 : index
    %c0_12 = arith.constant 0 : index
    %15 = vector.load %arg5[%c0_11, %c0_12] : memref<1x128xf32, #tpu.memory_space<vmem>>, vector<1x128xf32>
    %16 = vector.broadcast %15 : vector<1x128xf32> to vector<16x128xf32>
    %17 = arith.addf %14, %16 : vector<16x128xf32>
    %cst_13 = arith.constant 5.000000e-01 : f32
    %18 = vector.broadcast %cst_13 : f32 to vector<16x128xf32>
    %19 = arith.mulf %18, %17 : vector<16x128xf32>
    %20 = math.tanh %19 : vector<16x128xf32>
    %cst_14 = arith.constant 5.000000e-01 : f32
    %21 = vector.broadcast %cst_14 : f32 to vector<16x128xf32>
    %22 = arith.mulf %21, %20 : vector<16x128xf32>
    %cst_15 = arith.constant 5.000000e-01 : f32
    %23 = vector.broadcast %cst_15 : f32 to vector<16x128xf32>
    %24 = arith.addf %22, %23 : vector<16x128xf32>
    %c0_16 = arith.constant 0 : index
    %c0_17 = arith.constant 0 : index
    %25 = vector.load %arg6[%c0_16, %c0_17] : memref<128x16xf32, #tpu.memory_space<vmem>>, vector<128x16xf32>
    %cst_18 = arith.constant dense<0.000000e+00> : vector<16x16xf32>
    %26 = tpu.matmul %24, %25, %cst_18 {dimension_numbers = #tpu.dot_dimension_numbers<[1], [0], [0], [1], [0, 0, 1, 1], [], []>} : vector<16x128xf32>, vector<128x16xf32>, vector<16x16xf32> -> vector<16x16xf32>
    %c0_19 = arith.constant 0 : index
    %c0_20 = arith.constant 0 : index
    %27 = vector.load %arg7[%c0_19, %c0_20] : memref<1x16xf32, #tpu.memory_space<vmem>>, vector<1x16xf32>
    %28 = vector.broadcast %27 : vector<1x16xf32> to vector<16x16xf32>
    %29 = arith.addf %26, %28 : vector<16x16xf32>
    %c0_21 = arith.constant 0 : index
    %c0_22 = arith.constant 0 : index
    %30 = vector.load %arg8[%c0_21, %c0_22] : memref<16x16xf32, #tpu.memory_space<vmem>>, vector<16x16xf32>
    tpu.vector_store %arg8[%c0_21, %c0_22], %29 {strides = array<i32>} : memref<16x16xf32, #tpu.memory_space<vmem>>, vector<16x16xf32>,
    return
  }
  func.func @transform_0(%arg0: i32) -> (i32, i32) {
    %c0_i32 = arith.constant 0 : i32
    %c0_i32_0 = arith.constant 0 : i32
    return %arg0, %c0_i32 : i32, i32
  }
  func.func @transform_1(%arg0: i32) -> (i32, i32) {
    %c0_i32 = arith.constant 0 : i32
    %c0_i32_0 = arith.constant 0 : i32
    %c0_i32_1 = arith.constant 0 : i32
    return %c0_i32, %c0_i32_0 : i32, i32
  }
  func.func @transform_2(%arg0: i32) -> (i32, i32) {
    %c0_i32 = arith.constant 0 : i32
    %c0_i32_0 = arith.constant 0 : i32
    %c0_i32_1 = arith.constant 0 : i32
    return %c0_i32, %c0_i32_0 : i32, i32
  }
  func.func @transform_3(%arg0: i32) -> (i32, i32) {
    %c0_i32 = arith.constant 0 : i32
    %c0_i32_0 = arith.constant 0 : i32
    %c0_i32_1 = arith.constant 0 : i32
    return %c0_i32, %c0_i32_0 : i32, i32
  }
  func.func @transform_4(%arg0: i32) -> (i32, i32) {
    %c0_i32 = arith.constant 0 : i32
    %c0_i32_0 = arith.constant 0 : i32
    %c0_i32_1 = arith.constant 0 : i32
    return %c0_i32, %c0_i32_0 : i32, i32
  }
  func.func @transform_5(%arg0: i32) -> (i32, i32) {
    %c0_i32 = arith.constant 0 : i32
    %c0_i32_0 = arith.constant 0 : i32
    %c0_i32_1 = arith.constant 0 : i32
    return %c0_i32, %c0_i32_0 : i32, i32
  }
  func.func @transform_6(%arg0: i32) -> (i32, i32) {
    %c0_i32 = arith.constant 0 : i32
    %c0_i32_0 = arith.constant 0 : i32
    %c0_i32_1 = arith.constant 0 : i32
    return %c0_i32, %c0_i32_0 : i32, i32
  }
  func.func @transform_7(%arg0: i32) -> (i32, i32) {
    %c0_i32 = arith.constant 0 : i32
    %c0_i32_0 = arith.constant 0 : i32
    return %arg0, %c0_i32 : i32, i32
  }
}

</mosaic_0001>

<bundles_post_ra>
// kernel: tpu_custom_call.1
= control target key start
LH: loop header
LB: loop body
LE: loop exit
PB: predicated region body
PF: predicated region fallthrough
CT: control target
= control target key end

     0   :  { %12 = vsyncpa [#allocation3], 0  ;;  %s804_s0 = inlined_call_operand.vmem [shape: f32[16,16], index: 0, kind: input, shape index: {}]   ;;  %s805_s1 = inlined_call_operand.hbm [shape: f32[16,128], index: 1, kind: input, shape index: {}]   ;;  %s806_s2 = inlined_call_operand.vmem [shape: f32[1,128], index: 2, kind: input, shape index: {}]   ;;  %s807_s3 = inlined_call_operand.vmem [shape: f32[128,128], index: 3, kind: input, shape index: {}]   ;;  %s808_s4 = inlined_call_operand.vmem [shape: f32[1,128], index: 4, kind: input, shape index: {}]   ;;  %s809_s5 = inlined_call_operand.vmem [shape: f32[128,16], index: 5, kind: input, shape index: {}]   ;;  %s810_s6 = inlined_call_operand.vmem [shape: f32[1,16], index: 6, kind: input, shape index: {}]   ;;  %s811_s7 = inlined_call_operand.hbm [shape: f32[16,16], index: 7, kind: output, shape index: {}]  }
   0x1   :  { %13 = vsyncpa [#allocation4], 0  ;;  %s615_s24 = smov [#allocation2]   ;;  %s567_s28 = scalar_lea.hbm %s805_s1, 256 }
   0x2   :  { %s21_s25 = sshll.u32 %s615_s24, 4  ;;  %p568_p0 = scmp.ne.s32.totalorder %s805_s1, %s567_s28  ;;  %s22_s25 = int_to_ptr.vmem [resolvable:$true] %s21_s25 }
   0x3   :  { %p571_p1 = scmp.lt.u32.totalorder %s567_s28, %s805_s1 }
   0x5   :  { %p573_p2 = pnand %p571_p1, %p568_p0 }
   0x7   :  { %576 = shalt.err (!%p573_p2)
}
   0x8   :  { %s577_s10 = scalar_lea.vmem %s22_s25, 256  ;;  %p582_p4 = scmp.lt.s32.totalorder %s22_s25, %s22_s25 }
   0x9   :  { %p578_p3 = scmp.ne.s32.totalorder %s22_s25, %s577_s10  ;;  %p583_p5 = scmp.lt.s32.totalorder %s577_s10, %s577_s10 }
   0xb   :  { %p584_p6 = por %p583_p5, %p582_p4 }
   0xd   :  { %p585_p7 = pnand %p584_p6, %p578_p3 }
   0xf   :  { %588 = shalt.err (!%p585_p7)
}
  0x10   :  { %s616_s11 = smov 128   ;;  %s617_s12 = smov 8  }
  0x11   :  { %27 = dma.hbm_to_vmem [thread:$0]  %s805_s1, 256, %s22_s25, [#allocation3], %s616_s11, %s616_s11, %s617_s12  }
  0x12   :  { %611 = dma.done.wait [#allocation3], 256  }
  0x13   :  { %612 = vsyncadd [#allocation3], 4294967040  ;;  %vm52_vm0 = vcmask 130048   ;;  %v43_v0 = vld [vmem:[#allocation2] sm:$0xff]  ;;  %v44_v1 = vld [vmem:[#allocation2 + $0x8] sm:$0xff] }
  0x14   :  { %v41_v2 = vld [vmem:[%s804_s0] sm:$0xff]  ;;  %v487_v3 = vpack.c.bf16 %v44_v1, %v43_v0  ;;  %v143_v5 = vld [vmem:[%s807_s3 + $0x8] sm:$0xff]  ;;  %v144_v7 = vld [vmem:[%s807_s3 + $0x10] sm:$0xff] }
  0x15   :  { %414 = vmatprep.mubr.msk.f32.mxu0 %vm52_vm0, %v41_v2  ;;  %v142_v4 = vld [vmem:[%s807_s3] sm:$0xff]  ;;  %v145_v8 = vld [vmem:[%s807_s3 + $0x18] sm:$0xff]  ;;  %v147_v11 = vld [vmem:[%s807_s3 + $0x28] sm:$0xff] }
  0x16   :  { %v491_v6 = vpack.c.bf16 %v143_v5, %v142_v4  ;;  %488 = vmatprep.subr.bf16.mxu0 %v487_v3  ;;  %v495_v9 = vpack.c.bf16 %v145_v8, %v144_v7  ;;  %v146_v10 = vld [vmem:[%s807_s3 + $0x20] sm:$0xff]  ;;  %v42_v12 = vld [vmem:[%s804_s0 + $0x8] sm:$0xff]  ;;  %v148_v14 = vld [vmem:[%s807_s3 + $0x30] sm:$0xff] }
  0x17   :  { %490 = vmatpush3.bf16.msra.mxu0 %v487_v3  ;;  %v499_v13 = vpack.c.bf16 %v147_v11, %v146_v10  ;;  %v149_v15 = vld [vmem:[%s807_s3 + $0x38] sm:$0xff]  ;;  %v150_v17 = vld [vmem:[%s807_s3 + $0x40] sm:$0xff]  ;;  %v151_v18 = vld [vmem:[%s807_s3 + $0x48] sm:$0xff] }
  0x18   :  { %492 = vmatprep.subr.bf16.mxu1 %v491_v6  ;;  %v503_v16 = vpack.c.bf16 %v149_v15, %v148_v14  ;;  %v507_v19 = vpack.c.bf16 %v151_v18, %v150_v17  ;;  %v152_v20 = vld [vmem:[%s807_s3 + $0x50] sm:$0xff]  ;;  %v153_v21 = vld [vmem:[%s807_s3 + $0x58] sm:$0xff]  ;;  %v154_v23 = vld [vmem:[%s807_s3 + $0x60] sm:$0xff] }
  0x19   :  { %494 = vmatpush3.bf16.msra.mxu1 %v491_v6  ;;  %v511_v22 = vpack.c.bf16 %v153_v21, %v152_v20  ;;  %v155_v24 = vld [vmem:[%s807_s3 + $0x68] sm:$0xff]  ;;  %v156_v26 = vld [vmem:[%s807_s3 + $0x70] sm:$0xff]  ;;  %v157_v27 = vld [vmem:[%s807_s3 + $0x78] sm:$0xff] }
  0x1a   :  { %496 = vmatprep.subr.bf16.mxu1 %v495_v9  ;;  %415 = vmatmul.mubr.msk.f32.vlgmr.msra.gmra.mrb[0].mxu0 %vm52_vm0, %v42_v12  ;;  %v515_v25 = vpack.c.bf16 %v155_v24, %v154_v23  ;;  %v519_v28 = vpack.c.bf16 %v157_v27, %v156_v26  ;;  %v248_v29 = vld [vmem:[%s809_s5] sm:$0xff]  ;;  %v249_v30 = vld [vmem:[%s809_s5 + $0x8] sm:$0xff]  ;;  %v250_v31 = vld [vmem:[%s809_s5 + $0x10] sm:$0xff] }
  0x1b   :  { %v523_v32 = vpack.c.bf16 %v249_v30, %v248_v29  ;;  %v251_v33 = vld [vmem:[%s809_s5 + $0x18] sm:$0xff]  ;;  %v252_v35 = vld [vmem:[%s809_s5 + $0x20] sm:$0xff]  ;;  %v253_v36 = vld [vmem:[%s809_s5 + $0x28] sm:$0xff] }
  0x1c   :  { %v527_v34 = vpack.c.bf16 %v251_v33, %v250_v31  ;;  %v531_v37 = vpack.c.bf16 %v253_v36, %v252_v35  ;;  %v365_v38 = vld [vmem:[%s806_s2] ss:$0 sm:$0xff]  ;;  %v254_v51 = vld [vmem:[%s809_s5 + $0x30] sm:$0xff]  ;;  %v255_v52 = vld [vmem:[%s809_s5 + $0x38] sm:$0xff] }
  0x1d   :  { %498 = vmatpush3.bf16.msra.mxu1 %v495_v9  ;;  %524 = vmatprep.subr.bf16.mxu0 %v523_v32  ;;  %v535_v53 = vpack.c.bf16 %v255_v52, %v254_v51  ;;  %v256_v54 = vld [vmem:[%s809_s5 + $0x40] sm:$0xff]  ;;  %v257_v55 = vld [vmem:[%s809_s5 + $0x48] sm:$0xff]  ;;  %v258_v57 = vld [vmem:[%s809_s5 + $0x50] sm:$0xff] }
  0x1e   :  { %500 = vmatprep.subr.bf16.mxu1 %v499_v13  ;;  %526 = vmatpush3.bf16.msra.mxu0 %v523_v32  ;;  %v539_v56 = vpack.c.bf16 %v257_v55, %v256_v54  ;;  %v259_v58 = vld [vmem:[%s809_s5 + $0x58] sm:$0xff]  ;;  %v260_v60 = vld [vmem:[%s809_s5 + $0x60] sm:$0xff]  ;;  %v261_v61 = vld [vmem:[%s809_s5 + $0x68] sm:$0xff] }
  0x1f   :  { %528 = vmatprep.subr.bf16.mxu0 %v527_v34  ;;  %v543_v59 = vpack.c.bf16 %v259_v58, %v258_v57  ;;  %v547_v62 = vpack.c.bf16 %v261_v61, %v260_v60  ;;  %v262_v63 = vld [vmem:[%s809_s5 + $0x70] sm:$0xff]  ;;  %v263_v0 = vld [vmem:[%s809_s5 + $0x78] sm:$0xff]  ;;  %v368_v2 = vld [vmem:[%s808_s4] ss:$0 sm:$0xff]  ;;  %s618_s4 = smov [#allocation5]  }
  0x20   :  { %v551_v1 = vpack.c.bf16 %v263_v0, %v262_v63  ;;  %v369_v15 = vld [vmem:[%s810_s6] ss:$0 sm:$0xff]  ;;  %s353_s16 = sshll.u32 %s618_s4, 4  ;;  %s354_s16 = int_to_ptr.vmem [resolvable:$true] %s353_s16 }
  0x21   :  { %502 = vmatpush3.bf16.msra.mxu1 %v499_v13  ;;  %s589_s17 = scalar_lea.vmem %s354_s16, 256  ;;  %p594_p9 = scmp.lt.s32.totalorder %s354_s16, %s354_s16 }
  0x22   :  { %504 = vmatprep.subr.bf16.mxu1 %v503_v16  ;;  %530 = vmatpush3.bf16.msra.mxu0 %v527_v34  ;;  %p590_p8 = scmp.ne.s32.totalorder %s354_s16, %s589_s17  ;;  %p595_p10 = scmp.lt.s32.totalorder %s589_s17, %s589_s17 }
  0x23   :  { %532 = vmatprep.subr.bf16.mxu0 %v531_v37 }
  0x24   :  { %p596_p11 = por %p595_p10, %p594_p9 }
  0x25   :  { %506 = vmatpush3.bf16.msra.mxu1 %v503_v16 }
  0x26   :  { %508 = vmatprep.subr.bf16.mxu1 %v507_v19  ;;  %534 = vmatpush3.bf16.msra.mxu0 %v531_v37  ;;  %p597_p12 = pnand %p596_p11, %p590_p8 }
  0x27   :  { %536 = vmatprep.subr.bf16.mxu0 %v535_v53 }
  0x29   :  { %510 = vmatpush3.bf16.msra.mxu1 %v507_v19 }
  0x2a   :  { %512 = vmatprep.subr.bf16.mxu1 %v511_v22  ;;  %538 = vmatpush3.bf16.msra.mxu0 %v535_v53 }
  0x2b   :  { %540 = vmatprep.subr.bf16.mxu0 %v539_v56 }
  0x2d   :  { %514 = vmatpush3.bf16.msra.mxu1 %v511_v22 }
  0x2e   :  { %516 = vmatprep.subr.bf16.mxu1 %v515_v25  ;;  %542 = vmatpush3.bf16.msra.mxu0 %v539_v56 }
  0x2f   :  { %544 = vmatprep.subr.bf16.mxu0 %v543_v59 }
  0x31   :  { %518 = vmatpush3.bf16.msra.mxu1 %v515_v25 }
  0x32   :  { %520 = vmatprep.subr.bf16.mxu1 %v519_v28  ;;  %546 = vmatpush3.bf16.msra.mxu0 %v543_v59 }
  0x33   :  { %548 = vmatprep.subr.bf16.mxu0 %v547_v62 }
  0x35   :  { %522 = vmatpush3.bf16.msra.mxu1 %v519_v28 }
  0x36   :  { %550 = vmatpush3.bf16.msra.mxu0 %v547_v62 }
  0x37   :  { %552 = vmatprep.subr.bf16.mxu0 %v551_v1 }
  0x3a   :  { %554 = vmatpush3.bf16.msra.mxu0 %v551_v1 }
  0xed   :  { %v416_v39 = vpop.f32.mrb[0].mxu0 }
  0xee   :  { %v131_v40 = vadd.f32 %v416_v39, %v365_v38  ;;  %v125_v41 = vpop.f32.mrb[1].mxu0 }
  0xef   :  { %v126_v42 = vadd.f32 %v365_v38, %v125_v41 }
  0xf0   :  { %v135_v43 = vmul.f32 0.5, %v131_v40 }
  0xf1   :  { %v134_v44 = vmul.f32 0.5, %v126_v42 }
  0xf2   :  { %559 = vtanh.f32 %v135_v43 }
  0xf3   :  { %561 = vtanh.f32 %v134_v44 }
  0xfc   :  { %v560_v45 = vpop.eup %559 }
  0xfd   :  { %v562_v46 = vpop.eup %561  ;;  %v139_v47 = vmul.f32 0.5, %v560_v45 }
  0xfe   :  { %v138_v48 = vmul.f32 0.5, %v562_v46 }
  0xff   :  { %v141_v50 = vadd.f32 0.5, %v139_v47 }
 0x100   :  { %v140_v49 = vadd.f32 0.5, %v138_v48 }
 0x102   :  { %449 = vmatprep.mubr.f32.mxu1 %v140_v49 }
 0x103   :  { %450 = vmatmul.mubr.f32.vlgmr.msra.gmra.mrb[0].mxu1 %v141_v50 }
 0x1d6   :  { %v451_v3 = vpop.f32.mrb[0].mxu1 }
 0x1d7   :  { %v237_v4 = vadd.f32 %v451_v3, %v368_v2  ;;  %v231_v5 = vpop.f32.mrb[1].mxu1 }
 0x1d8   :  { %v232_v6 = vadd.f32 %v368_v2, %v231_v5 }
 0x1d9   :  { %v241_v7 = vmul.f32 0.5, %v237_v4 }
 0x1da   :  { %v240_v8 = vmul.f32 0.5, %v232_v6 }
 0x1db   :  { %563 = vtanh.f32 %v241_v7 }
 0x1dc   :  { %565 = vtanh.f32 %v240_v8 }
 0x1e5   :  { %v564_v9 = vpop.eup %563 }
 0x1e6   :  { %v566_v10 = vpop.eup %565  ;;  %v245_v11 = vmul.f32 0.5, %v564_v9 }
 0x1e7   :  { %v244_v12 = vmul.f32 0.5, %v566_v10 }
 0x1e8   :  { %v247_v14 = vadd.f32 0.5, %v245_v11 }
 0x1e9   :  { %v246_v13 = vadd.f32 0.5, %v244_v12 }
 0x1eb   :  { %484 = vmatprep.mubr.f32.mxu0 %v246_v13 }
 0x1ec   :  { %485 = vmatmul.mubr.f32.vlgmr.msra.gmra.mrb[2].mxu0 %v247_v14 }
 0x2bf   :  { %v486_v16 = vpop.f32.mrb[2].mxu0 }
 0x2c0   :  { %v343_v17 = vadd.f32 %v486_v16, %v369_v15  ;;  %v337_v18 = vpop.f32.mrb[3].mxu0 }
 0x2c1   :  { %v338_v19 = vadd.f32 %v369_v15, %v337_v18 }
 0x2c2   :  { %347 = vst.msk [vmem:[#allocation5 + $0x8] sm:$0xff] %vm52_vm0, %v343_v17 }
 0x2c3   :  { %346 = vst.msk [vmem:[#allocation5] sm:$0xff] %vm52_vm0, %v338_v19 }
 0x2c4   :  { %600 = shalt.err (!%p597_p12)
}
 0x2c5   :  { %s601_s19 = scalar_lea.hbm %s811_s7, 256 }
 0x2c6   :  { %p602_p13 = scmp.ne.s32.totalorder %s811_s7, %s601_s19  ;;  %p605_p0 = scmp.lt.u32.totalorder %s601_s19, %s811_s7 }
 0x2c8   :  { %p607_p1 = pnand %p605_p0, %p602_p13 }
 0x2ca   :  { %610 = shalt.err (!%p607_p1)
}
 0x2cb   :  { %359 = dma.vmem_to_hbm [thread:$0]  %s354_s16, 256, %s811_s7, [#allocation4], %s616_s11, %s616_s11, %s617_s12  }
 0x2cc   :  { %613 = dma.done.wait [#allocation4], 256  }
 0x2cd   :  { %614 = vsyncadd [#allocation4], 4294967040 }
 0x2ce   :  { %363 = vsyncpa [#allocation3], 1 }
 0x2cf   :  { %364 = vsyncpa [#allocation4], 1 }

</bundles_post_ra>
